<compile_context>
chip_gen: v5e
topology: v5e:2x2
jax: 0.10.0
libtpu: 0.0.40
codegen_flags: <defaults>
</compile_context>

<pallas_src>
import jax
import jax.numpy as jnp
from jax.experimental import pallas as pl
from jax.experimental.pallas import tpu as pltpu


def _round_up(x, m):
    return ((x + m - 1) // m) * m


def _make_mlp_kernel(num_hidden_layers):
    """Kernel signature:
       (x_tile, [w_h_i, b_h_i] * num_hidden_layers, w_p1, b_p1, w_p2, b_p2, out_tile)
    x_tile:  (tm, Hp)  portfolio embeddings (already scatter-summed)
    weights: pre-transposed to (in, out), zero-padded lane-dense
    biases:  (1, out) f32
    """

    def kernel(x_ref, *refs):
        out_ref = refs[-1]
        params = refs[:-1]

        x = x_ref[...]                                              # (tm, Hp)
        idx = 0
        for _ in range(num_hidden_layers):
            w = params[idx][...]
            b = params[idx + 1][...]
            idx += 2
            # Dropout(p=0) is identity; Linear + ReLU (MXU matmul, f32 accumulate)
            x = jnp.maximum(
                jnp.dot(x.astype(w.dtype), w,
                        preferred_element_type=jnp.float32) + b, 0.0)

        # pred_layer: Linear -> ReLU -> Linear
        w1 = params[idx][...]
        b1 = params[idx + 1][...]
        w2 = params[idx + 2][...]
        b2 = params[idx + 3][...]
        x = jnp.maximum(
            jnp.dot(x.astype(w1.dtype), w1,
                    preferred_element_type=jnp.float32) + b1, 0.0)
        out_ref[...] = (
            jnp.dot(x.astype(w2.dtype), w2,
                    preferred_element_type=jnp.float32) + b2
        ).astype(out_ref.dtype)

    return kernel


def mlp_recommender_forward(asset_indices, portfolio_indices, params,
                            num_portfolios, compute_dtype=jnp.float32):
    """Pallas-backed forward pass.

    asset_indices:     int32 (N,)  — asset embedding indices
    portfolio_indices: int32 (N,)  — which portfolio each asset belongs to
    params: dict with 'emb' (num_assets, H), hidden [('w_h_i','b_h_i')...],
            and 'w_p1','b_p1','w_p2','b_p2' (weights stored as (in, out)).
    Returns: (num_portfolios, num_assets) float32 scores.
    """
    num_hidden_layers = params['num_hidden_layers']
    hidden_dim = params['emb'].shape[1]
    num_assets = params['w_p2'].shape[1]
    P = num_portfolios

    # --- host-side glue: embedding gather + scatter-sum (no one-hot matmul) ---
    # TODO(synk): a further step is fusing this gather/segment-sum into the
    # kernel via PrefetchScalarGridSpec + data-dependent index_map; kept as
    # XLA glue here since it is O(N*H) and off the kernel's critical path.
    emb_gathered = jnp.take(params['emb'], asset_indices, axis=0)      # (N, H)
    x0 = jax.ops.segment_sum(emb_gathered, portfolio_indices,
                             num_segments=P)                           # (P, H)

    # --- lane-dense padding: (sublane=8, lane=128) aligned tiles ---
    Hp = _round_up(hidden_dim, 128)
    Ap = _round_up(num_assets, 128)
    if P >= 256:
        tm = 256            # fills the 2x256^2 MXU on v6e/v7x
    elif P >= 128:
        tm = 128
    else:
        tm = max(8, _round_up(P, 8))
    Pp = _round_up(P, tm)

    def pad2(a, rows, cols):
        return jnp.pad(a, ((0, rows - a.shape[0]), (0, cols - a.shape[1])))

    kernel_inputs = [pad2(x0, Pp, Hp).astype(compute_dtype)]
    in_specs = [pl.BlockSpec((tm, Hp), lambda i: (i, 0))]              # streamed rows

    def add_layer(w, b, out_cols):
        # Weights/biases zero-padded; constant index_map keeps them VMEM-resident
        # across the whole row grid (fetched once, no per-step re-DMA).
        kernel_inputs.append(pad2(w, Hp, out_cols).astype(compute_dtype))
        kernel_inputs.append(pad2(b, 1, out_cols).astype(jnp.float32))
        in_specs.append(pl.BlockSpec((Hp, out_cols), lambda i: (0, 0)))
        in_specs.append(pl.BlockSpec((1, out_cols), lambda i: (0, 0)))

    for i in range(num_hidden_layers):
        add_layer(params[f'w_h_{i}'], params[f'b_h_{i}'], Hp)
    add_layer(params['w_p1'], params['b_p1'], Hp)
    add_layer(params['w_p2'], params['b_p2'], Ap)

    # --- cost estimate + VMEM budget from the actual tile footprint ---
    flops = 2 * Pp * Hp * Hp * (num_hidden_layers + 1) + 2 * Pp * Hp * Ap
    bytes_in = sum(int(a.size) * a.dtype.itemsize for a in kernel_inputs)
    bytes_out = Pp * Ap * 4
    cost = pl.CostEstimate(flops=int(flops), transcendentals=0,
                           bytes_accessed=int(bytes_in + bytes_out))

    itemsize = jnp.dtype(compute_dtype).itemsize
    resident_weight_bytes = sum(int(a.size) * a.dtype.itemsize
                                for a in kernel_inputs[1:])
    tile_bytes = (2 * tm * Hp * itemsize      # double-buffered x tile
                  + 2 * tm * Ap * 4           # double-buffered output tile
                  + resident_weight_bytes)
    vmem_limit = int(min(64 << 20, max(4 << 20, 2 * tile_bytes)))  # v7x-safe

    out = pl.pallas_call(
        _make_mlp_kernel(num_hidden_layers),
        out_shape=jax.ShapeDtypeStruct((Pp, Ap), jnp.float32),
        grid=(Pp // tm,),
        in_specs=in_specs,
        out_specs=pl.BlockSpec((tm, Ap), lambda i: (i, 0)),
        compiler_params=pltpu.CompilerParams(
            dimension_semantics=("parallel",),
            vmem_limit_bytes=vmem_limit),
        cost_estimate=cost,
    )(*kernel_inputs)

    return out[:P, :num_assets]


def init_params(key, num_assets, hidden_dim, num_hidden_layers):
    """Deterministic synthetic parameter init (shapes follow the nn.Module)."""
    keys = jax.random.split(key, 3 + 2 * num_hidden_layers + 4)
    k_iter = iter(keys)
    params = {'num_hidden_layers': num_hidden_layers}

    # nn.Embedding(num_assets, hidden_dim)
    params['emb'] = jax.random.normal(
        next(k_iter), (num_assets, hidden_dim), jnp.float32) * 0.1

    # hidden layers: nn.Linear(hidden_dim, hidden_dim); store W as (in, out)
    for i in range(num_hidden_layers):
        params[f'w_h_{i}'] = jax.random.normal(
            next(k_iter), (hidden_dim, hidden_dim), jnp.float32) * 0.1
        params[f'b_h_{i}'] = jax.random.normal(
            next(k_iter), (1, hidden_dim), jnp.float32) * 0.01

    # pred_layer: Linear(hidden, hidden) -> ReLU -> Linear(hidden, num_assets)
    params['w_p1'] = jax.random.normal(
        next(k_iter), (hidden_dim, hidden_dim), jnp.float32) * 0.1
    params['b_p1'] = jax.random.normal(
        next(k_iter), (1, hidden_dim), jnp.float32) * 0.01
    params['w_p2'] = jax.random.normal(
        next(k_iter), (hidden_dim, num_assets), jnp.float32) * 0.1
    params['b_p2'] = jax.random.normal(
        next(k_iter), (1, num_assets), jnp.float32) * 0.01
    return params


def reference_forward(asset_indices, portfolio_indices, params, num_portfolios):
    """Pure-JAX reference of the PyTorch forward for correctness checking."""
    emb = jnp.take(params['emb'], asset_indices, axis=0)
    x = jax.ops.segment_sum(emb, portfolio_indices,
                            num_segments=num_portfolios)
    for i in range(params['num_hidden_layers']):
        x = jnp.maximum(x @ params[f'w_h_{i}'] + params[f'b_h_{i}'], 0.0)
    x = jnp.maximum(x @ params['w_p1'] + params['b_p1'], 0.0)
    return x @ params['w_p2'] + params['b_p2']


if __name__ == "__main__":
    # Small shapes consistent with the module's forward
    num_assets = 16          # size of the asset vocabulary == output dim
    hidden_dim = 32
    num_hidden_layers = 2
    num_portfolios = 4       # B
    assets_per_portfolio = 4 # -> N = 16 (asset_indices / portfolio_indices length)

    key = jax.random.PRNGKey(0)
    k_params, k_assets = jax.random.split(key)

    params = init_params(k_params, num_assets, hidden_dim, num_hidden_layers)

    n_total = num_portfolios * assets_per_portfolio
    asset_indices = jax.random.randint(
        k_assets, (n_total,), 0, num_assets, dtype=jnp.int32)
    portfolio_indices = jnp.repeat(
        jnp.arange(num_portfolios, dtype=jnp.int32), assets_per_portfolio)

    scores = mlp_recommender_forward(asset_indices, portfolio_indices,
                                     params, num_portfolios)
    scores = jax.block_until_ready(scores)

    ref = reference_forward(asset_indices, portfolio_indices,
                            params, num_portfolios)
    assert scores.shape == (num_portfolios, num_assets)
    assert jnp.allclose(scores, ref, atol=1e-4, rtol=1e-4), \
        "Pallas kernel mismatch vs reference"

    print("KERNEL_OK")
</pallas_src>

<mosaic_0001>
module attributes {stable_mosaic.version = 11 : i64} {
  func.func @kernel(%arg0: i32, %arg1: memref<8x128xf32, #tpu.memory_space<vmem>>, %arg2: memref<128x128xf32, #tpu.memory_space<vmem>>, %arg3: memref<1x128xf32, #tpu.memory_space<vmem>>, %arg4: memref<128x128xf32, #tpu.memory_space<vmem>>, %arg5: memref<1x128xf32, #tpu.memory_space<vmem>>, %arg6: memref<128x128xf32, #tpu.memory_space<vmem>>, %arg7: memref<1x128xf32, #tpu.memory_space<vmem>>, %arg8: memref<128x128xf32, #tpu.memory_space<vmem>>, %arg9: memref<1x128xf32, #tpu.memory_space<vmem>>, %arg10: memref<8x128xf32, #tpu.memory_space<vmem>>) attributes {dimension_semantics = [#tpu.dimension_semantics<parallel>], iteration_bounds = array<i64: 1>, scalar_prefetch = 0 : i64, scratch_operands = 0 : i64, tpu.core_type = #tpu.core_type<tc>, window_params = [{transform_indices = @transform_0, window_bounds = array<i64: 8, 128>}, {pipeline_mode = #tpu.pipeline_mode<synchronous>, transform_indices = @transform_1, window_bounds = array<i64: 128, 128>}, {pipeline_mode = #tpu.pipeline_mode<synchronous>, transform_indices = @transform_2, window_bounds = array<i64: 1, 128>}, {pipeline_mode = #tpu.pipeline_mode<synchronous>, transform_indices = @transform_3, window_bounds = array<i64: 128, 128>}, {pipeline_mode = #tpu.pipeline_mode<synchronous>, transform_indices = @transform_4, window_bounds = array<i64: 1, 128>}, {pipeline_mode = #tpu.pipeline_mode<synchronous>, transform_indices = @transform_5, window_bounds = array<i64: 128, 128>}, {pipeline_mode = #tpu.pipeline_mode<synchronous>, transform_indices = @transform_6, window_bounds = array<i64: 1, 128>}, {pipeline_mode = #tpu.pipeline_mode<synchronous>, transform_indices = @transform_7, window_bounds = array<i64: 128, 128>}, {pipeline_mode = #tpu.pipeline_mode<synchronous>, transform_indices = @transform_8, window_bounds = array<i64: 1, 128>}, {transform_indices = @transform_9, window_bounds = array<i64: 8, 128>}]} {
    %c0 = arith.constant 0 : index
    %c0_0 = arith.constant 0 : index
    %0 = vector.load %arg1[%c0, %c0_0] : memref<8x128xf32, #tpu.memory_space<vmem>>, vector<8x128xf32>
    %c0_1 = arith.constant 0 : index
    %c0_2 = arith.constant 0 : index
    %1 = vector.load %arg2[%c0_1, %c0_2] : memref<128x128xf32, #tpu.memory_space<vmem>>, vector<128x128xf32>
    %c0_3 = arith.constant 0 : index
    %c0_4 = arith.constant 0 : index
    %2 = vector.load %arg3[%c0_3, %c0_4] : memref<1x128xf32, #tpu.memory_space<vmem>>, vector<1x128xf32>
    %cst = arith.constant dense<0.000000e+00> : vector<8x128xf32>
    %3 = tpu.matmul %0, %1, %cst {dimension_numbers = #tpu.dot_dimension_numbers<[1], [0], [0], [1], [0, 0, 1, 1], [], []>} : vector<8x128xf32>, vector<128x128xf32>, vector<8x128xf32> -> vector<8x128xf32>
    %4 = vector.broadcast %2 : vector<1x128xf32> to vector<8x128xf32>
    %5 = arith.addf %3, %4 : vector<8x128xf32>
    %cst_5 = arith.constant 0.000000e+00 : f32
    %6 = vector.broadcast %cst_5 : f32 to vector<8x128xf32>
    %7 = arith.maximumf %5, %6 : vector<8x128xf32>
    %c0_6 = arith.constant 0 : index
    %c0_7 = arith.constant 0 : index
    %8 = vector.load %arg4[%c0_6, %c0_7] : memref<128x128xf32, #tpu.memory_space<vmem>>, vector<128x128xf32>
    %c0_8 = arith.constant 0 : index
    %c0_9 = arith.constant 0 : index
    %9 = vector.load %arg5[%c0_8, %c0_9] : memref<1x128xf32, #tpu.memory_space<vmem>>, vector<1x128xf32>
    %cst_10 = arith.constant dense<0.000000e+00> : vector<8x128xf32>
    %10 = tpu.matmul %7, %8, %cst_10 {dimension_numbers = #tpu.dot_dimension_numbers<[1], [0], [0], [1], [0, 0, 1, 1], [], []>} : vector<8x128xf32>, vector<128x128xf32>, vector<8x128xf32> -> vector<8x128xf32>
    %11 = vector.broadcast %9 : vector<1x128xf32> to vector<8x128xf32>
    %12 = arith.addf %10, %11 : vector<8x128xf32>
    %cst_11 = arith.constant 0.000000e+00 : f32
    %13 = vector.broadcast %cst_11 : f32 to vector<8x128xf32>
    %14 = arith.maximumf %12, %13 : vector<8x128xf32>
    %c0_12 = arith.constant 0 : index
    %c0_13 = arith.constant 0 : index
    %15 = vector.load %arg6[%c0_12, %c0_13] : memref<128x128xf32, #tpu.memory_space<vmem>>, vector<128x128xf32>
    %c0_14 = arith.constant 0 : index
    %c0_15 = arith.constant 0 : index
    %16 = vector.load %arg7[%c0_14, %c0_15] : memref<1x128xf32, #tpu.memory_space<vmem>>, vector<1x128xf32>
    %c0_16 = arith.constant 0 : index
    %c0_17 = arith.constant 0 : index
    %17 = vector.load %arg8[%c0_16, %c0_17] : memref<128x128xf32, #tpu.memory_space<vmem>>, vector<128x128xf32>
    %c0_18 = arith.constant 0 : index
    %c0_19 = arith.constant 0 : index
    %18 = vector.load %arg9[%c0_18, %c0_19] : memref<1x128xf32, #tpu.memory_space<vmem>>, vector<1x128xf32>
    %cst_20 = arith.constant dense<0.000000e+00> : vector<8x128xf32>
    %19 = tpu.matmul %14, %15, %cst_20 {dimension_numbers = #tpu.dot_dimension_numbers<[1], [0], [0], [1], [0, 0, 1, 1], [], []>} : vector<8x128xf32>, vector<128x128xf32>, vector<8x128xf32> -> vector<8x128xf32>
    %20 = vector.broadcast %16 : vector<1x128xf32> to vector<8x128xf32>
    %21 = arith.addf %19, %20 : vector<8x128xf32>
    %cst_21 = arith.constant 0.000000e+00 : f32
    %22 = vector.broadcast %cst_21 : f32 to vector<8x128xf32>
    %23 = arith.maximumf %21, %22 : vector<8x128xf32>
    %cst_22 = arith.constant dense<0.000000e+00> : vector<8x128xf32>
    %24 = tpu.matmul %23, %17, %cst_22 {dimension_numbers = #tpu.dot_dimension_numbers<[1], [0], [0], [1], [0, 0, 1, 1], [], []>} : vector<8x128xf32>, vector<128x128xf32>, vector<8x128xf32> -> vector<8x128xf32>
    %25 = vector.broadcast %18 : vector<1x128xf32> to vector<8x128xf32>
    %26 = arith.addf %24, %25 : vector<8x128xf32>
    %c0_23 = arith.constant 0 : index
    %c0_24 = arith.constant 0 : index
    %27 = vector.load %arg10[%c0_23, %c0_24] : memref<8x128xf32, #tpu.memory_space<vmem>>, vector<8x128xf32>
    tpu.vector_store %arg10[%c0_23, %c0_24], %26 {strides = array<i32>} : memref<8x128xf32, #tpu.memory_space<vmem>>, vector<8x128xf32>,
    return
  }
  func.func @transform_0(%arg0: i32) -> (i32, i32) {
    %c0_i32 = arith.constant 0 : i32
    %c0_i32_0 = arith.constant 0 : i32
    return %arg0, %c0_i32 : i32, i32
  }
  func.func @transform_1(%arg0: i32) -> (i32, i32) {
    %c0_i32 = arith.constant 0 : i32
    %c0_i32_0 = arith.constant 0 : i32
    %c0_i32_1 = arith.constant 0 : i32
    return %c0_i32, %c0_i32_0 : i32, i32
  }
  func.func @transform_2(%arg0: i32) -> (i32, i32) {
    %c0_i32 = arith.constant 0 : i32
    %c0_i32_0 = arith.constant 0 : i32
    %c0_i32_1 = arith.constant 0 : i32
    return %c0_i32, %c0_i32_0 : i32, i32
  }
  func.func @transform_3(%arg0: i32) -> (i32, i32) {
    %c0_i32 = arith.constant 0 : i32
    %c0_i32_0 = arith.constant 0 : i32
    %c0_i32_1 = arith.constant 0 : i32
    return %c0_i32, %c0_i32_0 : i32, i32
  }
  func.func @transform_4(%arg0: i32) -> (i32, i32) {
    %c0_i32 = arith.constant 0 : i32
    %c0_i32_0 = arith.constant 0 : i32
    %c0_i32_1 = arith.constant 0 : i32
    return %c0_i32, %c0_i32_0 : i32, i32
  }
  func.func @transform_5(%arg0: i32) -> (i32, i32) {
    %c0_i32 = arith.constant 0 : i32
    %c0_i32_0 = arith.constant 0 : i32
    %c0_i32_1 = arith.constant 0 : i32
    return %c0_i32, %c0_i32_0 : i32, i32
  }
  func.func @transform_6(%arg0: i32) -> (i32, i32) {
    %c0_i32 = arith.constant 0 : i32
    %c0_i32_0 = arith.constant 0 : i32
    %c0_i32_1 = arith.constant 0 : i32
    return %c0_i32, %c0_i32_0 : i32, i32
  }
  func.func @transform_7(%arg0: i32) -> (i32, i32) {
    %c0_i32 = arith.constant 0 : i32
    %c0_i32_0 = arith.constant 0 : i32
    %c0_i32_1 = arith.constant 0 : i32
    return %c0_i32, %c0_i32_0 : i32, i32
  }
  func.func @transform_8(%arg0: i32) -> (i32, i32) {
    %c0_i32 = arith.constant 0 : i32
    %c0_i32_0 = arith.constant 0 : i32
    %c0_i32_1 = arith.constant 0 : i32
    return %c0_i32, %c0_i32_0 : i32, i32
  }
  func.func @transform_9(%arg0: i32) -> (i32, i32) {
    %c0_i32 = arith.constant 0 : i32
    %c0_i32_0 = arith.constant 0 : i32
    return %arg0, %c0_i32 : i32, i32
  }
}

</mosaic_0001>

<bundles_post_ra>
// kernel: tpu_custom_call.1
= control target key start
LH: loop header
LB: loop body
LE: loop exit
PB: predicated region body
PF: predicated region fallthrough
CT: control target
= control target key end

     0   :  { %14 = vsyncpa [#allocation3], 0  ;;  %s545_s0 = inlined_call_operand.hbm [shape: f32[8,128], index: 0, kind: input, shape index: {}]   ;;  %s546_s1 = inlined_call_operand.hbm [shape: f32[128,128], index: 1, kind: input, shape index: {}]   ;;  %s547_s2 = inlined_call_operand.vmem [shape: f32[1,128], index: 2, kind: input, shape index: {}]   ;;  %s548_s3 = inlined_call_operand.hbm [shape: f32[128,128], index: 3, kind: input, shape index: {}]   ;;  %s549_s4 = inlined_call_operand.vmem [shape: f32[1,128], index: 4, kind: input, shape index: {}]   ;;  %s550_s5 = inlined_call_operand.hbm [shape: f32[128,128], index: 5, kind: input, shape index: {}]   ;;  %s551_s6 = inlined_call_operand.vmem [shape: f32[1,128], index: 6, kind: input, shape index: {}]   ;;  %s552_s7 = inlined_call_operand.hbm [shape: f32[128,128], index: 7, kind: input, shape index: {}]   ;;  %s553_s8 = inlined_call_operand.vmem [shape: f32[1,128], index: 8, kind: input, shape index: {}]   ;;  %s554_s9 = inlined_call_operand.hbm [shape: f32[8,128], index: 9, kind: output, shape index: {}]  }
   0x1   :  { %15 = vsyncpa [#allocation6], 0 }
   0x2   :  { %16 = vsyncpa [#allocation9], 0  ;;  %s33_s11 = sshll.u32 %s546_s1, 4  ;;  %s34_s11 = int_to_ptr.hbm [resolvable:$true] %s33_s11 }
   0x3   :  { %17 = vsyncpa [#allocation4], 0  ;;  %s457_s12 = smov [#allocation5]   ;;  %s63_s16 = sshll.u32 %s550_s5, 4  ;;  %s64_s16 = int_to_ptr.hbm [resolvable:$true] %s63_s16 }
   0x4   :  { %s35_s13 = sshll.u32 %s457_s12, 4  ;;  %s458_s17 = smov 128   ;;  %s36_s13 = int_to_ptr.vmem [resolvable:$true] %s35_s13 }
   0x5   :  { %s459_s18 = smov 8   ;;  %s460_s19 = smov [#allocation8]  }
   0x6   :  { %41 = dma.hbm_to_vmem [thread:$0]  %s34_s11, 2048, %s36_s13, [#allocation6], %s458_s17, %s458_s17, %s459_s18  }
   0x7   :  { %s65_s20 = sshll.u32 %s460_s19, 4  ;;  %s23_s23 = sshll.u32 %s545_s0, 4  ;;  %s66_s20 = int_to_ptr.vmem [resolvable:$true] %s65_s20  ;;  %s24_s23 = int_to_ptr.hbm [resolvable:$true] %s23_s23 }
   0x8   :  { %71 = dma.hbm_to_vmem [thread:$0]  %s64_s16, 2048, %s66_s20, [#allocation9], %s458_s17, %s458_s17, %s459_s18  }
   0x9   :  { %s48_s25 = sshll.u32 %s548_s3, 4  ;;  %s461_s26 = smov [#allocation2]   ;;  %s49_s25 = int_to_ptr.hbm [resolvable:$true] %s48_s25 }
   0xa   :  { %s25_s27 = sshll.u32 %s461_s26, 4  ;;  %s462_s5 = smov [#allocation7]   ;;  %s26_s27 = int_to_ptr.vmem [resolvable:$true] %s25_s27 }
   0xb   :  { %28 = dma.hbm_to_vmem [thread:$0]  %s24_s23, 128, %s26_s27, [#allocation3]  }
   0xc   :  { %s50_s28 = sshll.u32 %s462_s5, 4  ;;  %s78_s10 = sshll.u32 %s552_s7, 4  ;;  %s51_s28 = int_to_ptr.vmem [resolvable:$true] %s50_s28  ;;  %s79_s10 = int_to_ptr.hbm [resolvable:$true] %s78_s10 }
   0xd   :  { %56 = dma.hbm_to_vmem [thread:$0]  %s49_s25, 2048, %s51_s28, [#allocation6], %s458_s17, %s458_s17, %s459_s18  }
   0xe   :  { %s463_s0 = smov [#allocation10]  }
   0xf   :  { %s80_s11 = sshll.u32 %s463_s0, 4  ;;  %s81_s11 = int_to_ptr.vmem [resolvable:$true] %s80_s11 }
  0x10   :  { %86 = dma.hbm_to_vmem [thread:$0]  %s79_s10, 2048, %s81_s11, [#allocation9], %s458_s17, %s458_s17, %s459_s18  }
  0x11   :  { %449 = dma.done.wait [#allocation3], 128  }
  0x12   :  { %450 = vsyncadd [#allocation3], 4294967168 }
  0x13   :  { %451 = dma.done.wait [#allocation6], 4096  }
  0x14   :  { %452 = vsyncadd [#allocation6], 4294963200 }
  0x15   :  { %453 = dma.done.wait [#allocation9], 4096  }
  0x16   :  { %454 = vsyncadd [#allocation9], 4294963200  ;;  %v125_v0 = vld [vmem:[#allocation5 + $0x78] sm:$0xff]  ;;  %v124_v1 = vld [vmem:[#allocation5 + $0x70] sm:$0xff]  ;;  %s464_s16 = smov [#allocation11]   ;;  %s281_s20 = sshll.u32 %s554_s9, 4  ;;  %s282_s20 = int_to_ptr.hbm [resolvable:$true] %s281_s20 }
  0x17   :  { %130 = vmatpush.msra.mxu0 %v125_v0  ;;  %v123_v2 = vld [vmem:[#allocation5 + $0x68] sm:$0xff]  ;;  %v122_v3 = vld [vmem:[#allocation5 + $0x60] sm:$0xff]  ;;  %v166_v4 = vld [vmem:[#allocation7 + $0x78] sm:$0xff]  ;;  %s279_s17 = sshll.u32 %s464_s16, 4  ;;  %s280_s17 = int_to_ptr.vmem [resolvable:$true] %s279_s17 }
  0x18   :  { %v121_v5 = vld [vmem:[#allocation5 + $0x58] sm:$0xff]  ;;  %171 = vmatpush.msra.mxu1 %v166_v4  ;;  %v165_v6 = vld [vmem:[#allocation7 + $0x70] sm:$0xff]  ;;  %v164_v7 = vld [vmem:[#allocation7 + $0x68] sm:$0xff] }
  0x19   :  { %131 = vmatpush.msra.mxu0 %v124_v1  ;;  %v120_v8 = vld [vmem:[#allocation5 + $0x50] sm:$0xff]  ;;  %v163_v9 = vld [vmem:[#allocation7 + $0x60] sm:$0xff]  ;;  %v119_v10 = vld [vmem:[#allocation5 + $0x48] sm:$0xff] }
  0x1a   :  { %172 = vmatpush.msra.mxu1 %v165_v6  ;;  %v162_v11 = vld [vmem:[#allocation7 + $0x58] sm:$0xff]  ;;  %v118_v12 = vld [vmem:[#allocation5 + $0x40] sm:$0xff]  ;;  %v161_v13 = vld [vmem:[#allocation7 + $0x50] sm:$0xff] }
  0x1b   :  { %132 = vmatpush.msra.mxu0 %v123_v2  ;;  %v117_v14 = vld [vmem:[#allocation5 + $0x38] sm:$0xff]  ;;  %v160_v15 = vld [vmem:[#allocation7 + $0x48] sm:$0xff]  ;;  %v116_v16 = vld [vmem:[#allocation5 + $0x30] sm:$0xff] }
  0x1c   :  { %173 = vmatpush.msra.mxu1 %v164_v7  ;;  %v159_v17 = vld [vmem:[#allocation7 + $0x40] sm:$0xff]  ;;  %v115_v18 = vld [vmem:[#allocation5 + $0x28] sm:$0xff]  ;;  %v158_v19 = vld [vmem:[#allocation7 + $0x38] sm:$0xff] }
  0x1d   :  { %133 = vmatpush.msra.mxu0 %v122_v3  ;;  %v114_v20 = vld [vmem:[#allocation5 + $0x20] sm:$0xff]  ;;  %v157_v21 = vld [vmem:[#allocation7 + $0x30] sm:$0xff]  ;;  %v113_v22 = vld [vmem:[#allocation5 + $0x18] sm:$0xff] }
  0x1e   :  { %174 = vmatpush.msra.mxu1 %v163_v9  ;;  %v156_v23 = vld [vmem:[#allocation7 + $0x28] sm:$0xff]  ;;  %v112_v24 = vld [vmem:[#allocation5 + $0x10] sm:$0xff]  ;;  %v155_v25 = vld [vmem:[#allocation7 + $0x20] sm:$0xff] }
  0x1f   :  { %134 = vmatpush.msra.mxu0 %v121_v5  ;;  %v111_v26 = vld [vmem:[#allocation5 + $0x8] sm:$0xff]  ;;  %v154_v27 = vld [vmem:[#allocation7 + $0x18] sm:$0xff]  ;;  %v110_v28 = vld [vmem:[#allocation5] sm:$0xff] }
  0x20   :  { %175 = vmatpush.msra.mxu1 %v162_v11  ;;  %v109_v29 = vld [vmem:[#allocation2] sm:$0xff]  ;;  %v153_v30 = vld [vmem:[#allocation7 + $0x10] sm:$0xff]  ;;  %v152_v31 = vld [vmem:[#allocation7 + $0x8] sm:$0xff] }
  0x21   :  { %135 = vmatpush.msra.mxu0 %v120_v8  ;;  %v151_v32 = vld [vmem:[#allocation7] sm:$0xff]  ;;  %v207_v33 = vld [vmem:[#allocation8 + $0x78] sm:$0xff]  ;;  %v206_v34 = vld [vmem:[#allocation8 + $0x70] sm:$0xff] }
  0x22   :  { %176 = vmatpush.msra.mxu1 %v161_v13  ;;  %229 = vmatpush.msra.mxu2 %v207_v33  ;;  %v205_v35 = vld [vmem:[#allocation8 + $0x68] sm:$0xff]  ;;  %v204_v36 = vld [vmem:[#allocation8 + $0x60] sm:$0xff]  ;;  %v203_v37 = vld [vmem:[#allocation8 + $0x58] sm:$0xff] }
  0x23   :  { %136 = vmatpush.msra.mxu0 %v119_v10  ;;  %v202_v38 = vld [vmem:[#allocation8 + $0x50] sm:$0xff]  ;;  %v201_v39 = vld [vmem:[#allocation8 + $0x48] sm:$0xff]  ;;  %v200_v40 = vld [vmem:[#allocation8 + $0x40] sm:$0xff] }
  0x24   :  { %177 = vmatpush.msra.mxu1 %v160_v15  ;;  %230 = vmatpush.msra.mxu2 %v206_v34  ;;  %v199_v41 = vld [vmem:[#allocation8 + $0x38] sm:$0xff]  ;;  %v198_v42 = vld [vmem:[#allocation8 + $0x30] sm:$0xff]  ;;  %v197_v43 = vld [vmem:[#allocation8 + $0x28] sm:$0xff] }
  0x25   :  { %137 = vmatpush.msra.mxu0 %v118_v12  ;;  %v196_v44 = vld [vmem:[#allocation8 + $0x20] sm:$0xff]  ;;  %v195_v45 = vld [vmem:[#allocation8 + $0x18] sm:$0xff]  ;;  %v194_v50 = vld [vmem:[#allocation8 + $0x10] sm:$0xff] }
  0x26   :  { %178 = vmatpush.msra.mxu1 %v159_v17  ;;  %231 = vmatpush.msra.mxu2 %v205_v35  ;;  %v301_v46 = vld [vmem:[%s547_s2] ss:$0 sm:$0xff]  ;;  %v193_v51 = vld [vmem:[#allocation8 + $0x8] sm:$0xff]  ;;  %v192_v52 = vld [vmem:[#allocation8] sm:$0xff] }
  0x27   :  { %138 = vmatpush.msra.mxu0 %v117_v14  ;;  %v224_v53 = vld [vmem:[#allocation10 + $0x78] sm:$0xff]  ;;  %v223_v54 = vld [vmem:[#allocation10 + $0x70] sm:$0xff]  ;;  %v222_v55 = vld [vmem:[#allocation10 + $0x68] sm:$0xff] }
  0x28   :  { %179 = vmatpush.msra.mxu1 %v158_v19  ;;  %232 = vmatpush.msra.mxu2 %v204_v36  ;;  %v221_v56 = vld [vmem:[#allocation10 + $0x60] sm:$0xff]  ;;  %v220_v57 = vld [vmem:[#allocation10 + $0x58] sm:$0xff]  ;;  %v219_v58 = vld [vmem:[#allocation10 + $0x50] sm:$0xff] }
  0x29   :  { %139 = vmatpush.msra.mxu0 %v116_v16  ;;  %253 = vmatpush.msra.mxu3 %v224_v53  ;;  %v218_v59 = vld [vmem:[#allocation10 + $0x48] sm:$0xff]  ;;  %v217_v60 = vld [vmem:[#allocation10 + $0x40] sm:$0xff]  ;;  %v216_v61 = vld [vmem:[#allocation10 + $0x38] sm:$0xff] }
  0x2a   :  { %180 = vmatpush.msra.mxu1 %v157_v21  ;;  %233 = vmatpush.msra.mxu2 %v203_v37  ;;  %v215_v62 = vld [vmem:[#allocation10 + $0x30] sm:$0xff]  ;;  %v214_v63 = vld [vmem:[#allocation10 + $0x28] sm:$0xff]  ;;  %v213_v0 = vld [vmem:[#allocation10 + $0x20] sm:$0xff] }
  0x2b   :  { %140 = vmatpush.msra.mxu0 %v115_v18  ;;  %254 = vmatpush.msra.mxu3 %v223_v54  ;;  %v212_v1 = vld [vmem:[#allocation10 + $0x18] sm:$0xff]  ;;  %v211_v6 = vld [vmem:[#allocation10 + $0x10] sm:$0xff]  ;;  %v210_v7 = vld [vmem:[#allocation10 + $0x8] sm:$0xff] }
  0x2c   :  { %181 = vmatpush.msra.mxu1 %v156_v23  ;;  %234 = vmatpush.msra.mxu2 %v202_v38  ;;  %v302_v2 = vld [vmem:[%s549_s4] ss:$0 sm:$0xff]  ;;  %v209_v8 = vld [vmem:[#allocation10] sm:$0xff] }
  0x2d   :  { %141 = vmatpush.msra.mxu0 %v114_v20  ;;  %255 = vmatpush.msra.mxu3 %v222_v55  ;;  %v303_v9 = vld [vmem:[%s551_s6] ss:$0 sm:$0xff] }
  0x2e   :  { %182 = vmatpush.msra.mxu1 %v155_v25  ;;  %235 = vmatpush.msra.mxu2 %v201_v39  ;;  %v304_v13 = vld [vmem:[%s553_s8] ss:$0 sm:$0xff] }
  0x2f   :  { %142 = vmatpush.msra.mxu0 %v113_v22  ;;  %256 = vmatpush.msra.mxu3 %v221_v56 }
  0x30   :  { %183 = vmatpush.msra.mxu1 %v154_v27  ;;  %236 = vmatpush.msra.mxu2 %v200_v40 }
  0x31   :  { %143 = vmatpush.msra.mxu0 %v112_v24  ;;  %257 = vmatpush.msra.mxu3 %v220_v57 }
  0x32   :  { %184 = vmatpush.msra.mxu1 %v153_v30  ;;  %237 = vmatpush.msra.mxu2 %v199_v41 }
  0x33   :  { %144 = vmatpush.msra.mxu0 %v111_v26  ;;  %258 = vmatpush.msra.mxu3 %v219_v58 }
  0x34   :  { %185 = vmatpush.msra.mxu1 %v152_v31  ;;  %238 = vmatpush.msra.mxu2 %v198_v42 }
  0x35   :  { %145 = vmatpush.msra.mxu0 %v110_v28  ;;  %259 = vmatpush.msra.mxu3 %v218_v59 }
  0x36   :  { %146 = vmatmul.f32.vlgmr.msra.gmra.mxu0 %v109_v29  ;;  %186 = vmatpush.msra.mxu1 %v151_v32 }
  0x37   :  { %239 = vmatpush.msra.mxu2 %v197_v43  ;;  %260 = vmatpush.msra.mxu3 %v217_v60 }
  0x39   :  { %240 = vmatpush.msra.mxu2 %v196_v44  ;;  %261 = vmatpush.msra.mxu3 %v216_v61 }
  0x3b   :  { %241 = vmatpush.msra.mxu2 %v195_v45  ;;  %262 = vmatpush.msra.mxu3 %v215_v62 }
  0x3d   :  { %242 = vmatpush.msra.mxu2 %v194_v50  ;;  %263 = vmatpush.msra.mxu3 %v214_v63 }
  0x3f   :  { %243 = vmatpush.msra.mxu2 %v193_v51  ;;  %264 = vmatpush.msra.mxu3 %v213_v0 }
  0x41   :  { %244 = vmatpush.msra.mxu2 %v192_v52  ;;  %265 = vmatpush.msra.mxu3 %v212_v1 }
  0x43   :  { %266 = vmatpush.msra.mxu3 %v211_v6 }
  0x45   :  { %267 = vmatpush.msra.mxu3 %v210_v7 }
  0x47   :  { %268 = vmatpush.msra.mxu3 %v209_v8 }
  0xb3   :  { %v147_v47 = vpop.f32.mrf.mxu0 }
  0xb4   :  { %v148_v48 = vadd.f32 %v301_v46, %v147_v47 }
  0xb6   :  { %v150_v49 = vmax.f32 %v148_v48, 0.0 }
  0xb8   :  { %187 = vmatmul.f32.vlgmr.msra.gmra.mxu1 %v150_v49 }
 0x135   :  { %v188_v3 = vpop.f32.mrf.mxu1 }
 0x136   :  { %v189_v4 = vadd.f32 %v302_v2, %v188_v3 }
 0x138   :  { %v191_v5 = vmax.f32 %v189_v4, 0.0 }
 0x13a   :  { %245 = vmatmul.f32.vlgmr.msra.gmra.mxu2 %v191_v5 }
 0x1bd   :  { %v246_v10 = vpop.f32.mrf.mxu2 }
 0x1be   :  { %v247_v11 = vadd.f32 %v303_v9, %v246_v10 }
 0x1c0   :  { %v249_v12 = vmax.f32 %v247_v11, 0.0 }
 0x1c2   :  { %269 = vmatmul.f32.vlgmr.msra.gmra.mxu3 %v249_v12 }
 0x245   :  { %v270_v14 = vpop.f32.mrf.mxu3 }
 0x246   :  { %v271_v15 = vadd.f32 %v304_v13, %v270_v14 }
 0x248   :  { %273 = vst [vmem:[#allocation11] sm:$0xff] %v271_v15 }
 0x249   :  { %284 = dma.vmem_to_hbm [thread:$0]  %s280_s17, 128, %s282_s20, [#allocation4]  }
 0x24a   :  { %455 = dma.done.wait [#allocation4], 128  }
 0x24b   :  { %456 = vsyncadd [#allocation4], 4294967168 }
 0x24c   :  { %289 = vsyncpa [#allocation3], 1 }
 0x24d   :  { %290 = vsyncpa [#allocation6], 1 }
 0x24e   :  { %291 = vsyncpa [#allocation9], 1 }
 0x24f   :  { %292 = vsyncpa [#allocation4], 1 }

</bundles_post_ra>
